<compile_context>
chip_gen: v7x
topology: tpu7x:2x2x1
jax: 0.10.0
libtpu: 0.0.40
codegen_flags: <defaults>
</compile_context>

<pallas_src>
import math

import numpy as np
import jax
import jax.numpy as jnp
from jax.experimental import pallas as pl
from jax.experimental.pallas import tpu as pltpu


_LANES = 128
_TARGET_TILE_BYTES = 2 * 1024 * 1024   # ~2 MiB f32 output tiles (good on v5e/v6e/v7x)
_MAX_FLAT_TILE_ROWS = 4096             # (4096, 128) f32 = 2 MiB


# ----------------------------------------------------------------------------
# Parameter setup (trace-time glue, mirrors KernelGenerator.__init__)
# ----------------------------------------------------------------------------
def _pair(x):
    return (x, x) if isinstance(x, int) else tuple(x)


def _offsets(size, offset):
    if offset is None:
        return float(size // 2), float(size // 2)
    ox, oy = _pair(offset)
    return float(ox), float(oy)


def _factor_max(size, ox, oy):
    """max over the (size,size) grid of -((x-ox)^2+(y-oy)^2)/2, analytically.

    (0.0 for the default centered offset.)  Trace-time Python float.
    """
    def nearest_sq(o):
        c = min(max(o, 0.0), float(size - 1))
        return (c - o) ** 2
    return -0.5 * (nearest_sq(ox) + nearest_sq(oy))


def _np_factor(size, ox, oy):
    """The precomputed factor buffer, as a trace-time numpy constant."""
    xx, yy = np.meshgrid(np.arange(size), np.arange(size))   # 'xy' indexing, as in torch module
    return (-(np.power(xx - ox, 2) + np.power(yy - oy, 2)) / 2.0).astype(np.float32)


# ----------------------------------------------------------------------------
# Kernel bodies (size / offsets / f_max baked in statically; theta in SMEM)
# ----------------------------------------------------------------------------
def _body_2d_iota(size, ox, oy, f_max, tile_rows, tile_cols):
    """Write-only kernel on the natural (size, size) layout; size % 128 == 0."""
    size_f = float(size)

    def body(theta_ref, out_ref):
        theta = theta_ref[0]                          # SMEM scalar
        inv_pow2 = 1.0 / (theta * size_f) ** 2        # scalar, computed once
        r0 = pl.program_id(0) * tile_rows
        c0 = pl.program_id(1) * tile_cols
        rr = jax.lax.broadcasted_iota(jnp.int32, out_ref.shape, 0) + r0   # grid row  (yy)
        cc = jax.lax.broadcasted_iota(jnp.int32, out_ref.shape, 1) + c0   # grid col  (xx)
        dy = rr.astype(jnp.float32) - oy
        dx = cc.astype(jnp.float32) - ox
        f = -0.5 * (dx * dx + dy * dy)
        if f_max != 0.0:
            f = f - f_max
        out_ref[...] = jnp.exp(f * inv_pow2).astype(out_ref.dtype)

    return body


def _body_flat_pow2(size, ox, oy, f_max, tile_rows):
    """Write-only kernel on a lane-dense (rows, 128) slab; size is a power of two."""
    size_f = float(size)
    shift = int(size).bit_length() - 1
    mask = size - 1

    def body(theta_ref, out_ref):
        theta = theta_ref[0]
        inv_pow2 = 1.0 / (theta * size_f) ** 2
        r = jax.lax.broadcasted_iota(jnp.int32, out_ref.shape, 0) + pl.program_id(0) * tile_rows
        lane = jax.lax.broadcasted_iota(jnp.int32, out_ref.shape, 1)
        idx = r * _LANES + lane                       # flat index into (size*size) row-major
        col = idx & mask                              # xx
        row = idx >> shift                            # yy  (padded idx -> row>=size -> underflows, sliced off)
        dx = col.astype(jnp.float32) - ox
        dy = row.astype(jnp.float32) - oy
        f = -0.5 * (dx * dx + dy * dy)
        if f_max != 0.0:
            f = f - f_max
        out_ref[...] = jnp.exp(f * inv_pow2).astype(out_ref.dtype)

    return body


def _body_flat_factor(size, f_max):
    """Fallback kernel: factor DMA'd in (lane-dense slab), normalization folded into exp."""
    size_f = float(size)

    def body(theta_ref, factor_ref, out_ref):
        theta = theta_ref[0]
        inv_pow2 = 1.0 / (theta * size_f) ** 2
        f = factor_ref[...]
        if f_max != 0.0:
            f = f - f_max
        out_ref[...] = jnp.exp(f * inv_pow2).astype(out_ref.dtype)

    return body


# ----------------------------------------------------------------------------
# Forward wrapper
# ----------------------------------------------------------------------------
def _forward_xla(theta, size, offset=None):
    """Pure-JAX forward, mirroring the PyTorch module exactly."""
    ox, oy = _offsets(size, offset)
    factor = jnp.asarray(_np_factor(size, ox, oy))
    pow2 = (theta * size) ** 2
    kernel = 1.0 / (2.0 * math.pi * pow2) * jnp.exp(factor / pow2)
    return kernel / jnp.max(kernel)


def kernel_generator_forward(theta, size, offset=None, *,
                             out_dtype=jnp.float32,
                             xla_small_threshold=0):
    """KernelGenerator.forward(theta) -> (size, size) array.

    theta: scalar (float).  size/offset: static Python config (as in __init__).
    xla_small_threshold: if size*size <= threshold, skip the standalone
      pallas_call (launch overhead dominates tiny problems) and let XLA fuse.
      Default 0 so the Pallas kernel is always exercised here.
    """
    ox, oy = _offsets(size, offset)
    f_max = _factor_max(size, ox, oy)                  # trace-time Python constant
    n = size * size

    if n <= xla_small_threshold:
        # TODO(synk): for production, fuse this generator as a prologue of its consumer kernel.
        return _forward_xla(theta, size, offset).astype(out_dtype)

    theta_arr = jnp.reshape(jnp.asarray(theta, jnp.float32), (1,))   # -> SMEM

    # ---- Path A: size is a multiple of 128 -> natural 2D layout, write-only --
    if size % _LANES == 0:
        tile_cols = min(size, 2048)                                  # multiple of 128
        tile_rows = max(8, min(size, _TARGET_TILE_BYTES // (4 * tile_cols)))
        if tile_rows < size:
            tile_rows -= tile_rows % 8
        grid = (pl.cdiv(size, tile_rows), pl.cdiv(size, tile_cols))
        body = _body_2d_iota(size, ox, oy, f_max, tile_rows, tile_cols)
        return pl.pallas_call(
            body,
            out_shape=jax.ShapeDtypeStruct((size, size), out_dtype),
            grid=grid,
            in_specs=[pl.BlockSpec(memory_space=pltpu.MemorySpace.SMEM)],   # theta
            out_specs=pl.BlockSpec((tile_rows, tile_cols), lambda i, j: (i, j)),
            compiler_params=pltpu.CompilerParams(
                dimension_semantics=("parallel", "parallel")),
            cost_estimate=pl.CostEstimate(flops=8 * n, transcendentals=n,
                                          bytes_accessed=4 * n),
        )(theta_arr)

    rows = pl.cdiv(n, _LANES)                 # lane-dense slab height (padded)
    tile_rows = min(rows, _MAX_FLAT_TILE_ROWS)
    if tile_rows < rows:
        tile_rows -= tile_rows % 8
    grid = (pl.cdiv(rows, tile_rows),)
    out_slab = jax.ShapeDtypeStruct((rows, _LANES), out_dtype)
    common = dict(
        out_shape=out_slab,
        grid=grid,
        out_specs=pl.BlockSpec((tile_rows, _LANES), lambda i: (i, 0)),
        compiler_params=pltpu.CompilerParams(dimension_semantics=("parallel",)),
    )

    # ---- Path B: power-of-two size (< 128) -> write-only flat layout ---------
    if size & (size - 1) == 0:
        body = _body_flat_pow2(size, ox, oy, f_max, tile_rows)
        out_flat = pl.pallas_call(
            body,
            in_specs=[pl.BlockSpec(memory_space=pltpu.MemorySpace.SMEM)],
            cost_estimate=pl.CostEstimate(flops=8 * n, transcendentals=n,
                                          bytes_accessed=4 * n),
            **common,
        )(theta_arr)
    # ---- Path C: general size -> factor as trace-time constant, DMA'd in -----
    else:
        flat = _np_factor(size, ox, oy).reshape(-1)
        pad = rows * _LANES - n
        if pad:
            # pad with f_max so padded lanes give exp(0)=1 (finite); sliced off below
            flat = np.concatenate([flat, np.full((pad,), f_max, np.float32)])
        fac = jnp.asarray(flat.reshape(rows, _LANES), jnp.float32)
        body = _body_flat_factor(size, f_max)
        out_flat = pl.pallas_call(
            body,
            in_specs=[pl.BlockSpec(memory_space=pltpu.MemorySpace.SMEM),
                      pl.BlockSpec((tile_rows, _LANES), lambda i: (i, 0))],
            cost_estimate=pl.CostEstimate(flops=2 * n, transcendentals=n,
                                          bytes_accessed=8 * n),
            **common,
        )(theta_arr, fac)

    return out_flat.reshape(-1)[:n].reshape(size, size)


# ----------------------------------------------------------------------------
# Self-test
# ----------------------------------------------------------------------------
if __name__ == "__main__":
    key = jax.random.PRNGKey(0)
    theta = jax.random.uniform(key, (), jnp.float32, minval=0.1, maxval=1.0)

    # size=16 is the module's native tiny case (write-only pow2 flat path);
    # 20 exercises the lane-padded factor-constant path; 1000 its multi-tile
    # gridded variant; 1024 the write-only 2D-iota gridded path.
    for size in (16, 20, 1000, 1024):
        out = jax.block_until_ready(kernel_generator_forward(theta, size))
        ref = _forward_xla(theta, size)
        assert out.shape == (size, size), (size, out.shape)
        assert out.dtype == jnp.float32
        assert bool(jnp.allclose(out, ref, rtol=1e-5, atol=1e-6)), f"mismatch at size={size}"

    print("KERNEL_OK")
</pallas_src>

<mosaic_0001>
module attributes {stable_mosaic.version = 11 : i64} {
  func.func @body(%arg0: i32, %arg1: memref<1xf32, #tpu.memory_space<smem>>, %arg2: memref<2x128xf32, #tpu.memory_space<vmem>>) attributes {dimension_semantics = [#tpu.dimension_semantics<parallel>], iteration_bounds = array<i64: 1>, scalar_prefetch = 0 : i64, scratch_operands = 0 : i64, tpu.core_type = #tpu.core_type<tc>, window_params = [{transform_indices = @transform_0, window_bounds = array<i64: 1>}, {transform_indices = @transform_1, window_bounds = array<i64: 2, 128>}]} {
    %c0 = arith.constant 0 : index
    %0 = memref.load %arg1[%c0] : memref<1xf32, #tpu.memory_space<smem>>
    %cst = arith.constant 1.600000e+01 : f32
    %1 = arith.mulf %0, %cst : f32
    %2 = arith.mulf %1, %1 : f32
    %cst_0 = arith.constant 1.000000e+00 : f32
    %3 = arith.divf %cst_0, %2 : f32
    %4 = tpu.iota {dimensions = array<i32: 0>} : vector<2x128xi32>
    %c2_i32 = arith.constant 2 : i32
    %5 = arith.muli %arg0, %c2_i32 : i32
    %6 = vector.broadcast %5 : i32 to vector<2x128xi32>
    %7 = arith.addi %4, %6 : vector<2x128xi32>
    %8 = tpu.iota {dimensions = array<i32: 1>} : vector<2x128xi32>
    %c128_i32 = arith.constant 128 : i32
    %9 = vector.broadcast %c128_i32 : i32 to vector<2x128xi32>
    %10 = arith.muli %7, %9 : vector<2x128xi32>
    %11 = arith.addi %10, %8 : vector<2x128xi32>
    %c15_i32 = arith.constant 15 : i32
    %12 = vector.broadcast %c15_i32 : i32 to vector<2x128xi32>
    %13 = arith.andi %11, %12 : vector<2x128xi32>
    %c4_i32 = arith.constant 4 : i32
    %14 = vector.broadcast %c4_i32 : i32 to vector<2x128xi32>
    %15 = arith.shrsi %11, %14 : vector<2x128xi32>
    %16 = arith.sitofp %13 : vector<2x128xi32> to vector<2x128xf32>
    %cst_1 = arith.constant 8.000000e+00 : f32
    %17 = vector.broadcast %cst_1 : f32 to vector<2x128xf32>
    %18 = arith.subf %16, %17 : vector<2x128xf32>
    %19 = arith.sitofp %15 : vector<2x128xi32> to vector<2x128xf32>
    %cst_2 = arith.constant 8.000000e+00 : f32
    %20 = vector.broadcast %cst_2 : f32 to vector<2x128xf32>
    %21 = arith.subf %19, %20 : vector<2x128xf32>
    %22 = arith.mulf %18, %18 : vector<2x128xf32>
    %23 = arith.mulf %21, %21 : vector<2x128xf32>
    %24 = arith.addf %22, %23 : vector<2x128xf32>
    %cst_3 = arith.constant -5.000000e-01 : f32
    %25 = vector.broadcast %cst_3 : f32 to vector<2x128xf32>
    %26 = arith.mulf %25, %24 : vector<2x128xf32>
    %27 = vector.broadcast %3 : f32 to vector<2x128xf32>
    %28 = arith.mulf %26, %27 : vector<2x128xf32>
    %29 = math.exp %28 : vector<2x128xf32>
    %c0_4 = arith.constant 0 : index
    %c0_5 = arith.constant 0 : index
    %30 = vector.load %arg2[%c0_4, %c0_5] : memref<2x128xf32, #tpu.memory_space<vmem>>, vector<2x128xf32>
    tpu.vector_store %arg2[%c0_4, %c0_5], %29 {strides = array<i32>} : memref<2x128xf32, #tpu.memory_space<vmem>>, vector<2x128xf32>,
    return
  }
  func.func @transform_0(%arg0: i32) -> i32 {
    %c0_i32 = arith.constant 0 : i32
    %c0_i32_0 = arith.constant 0 : i32
    return %c0_i32 : i32
  }
  func.func @transform_1(%arg0: i32) -> (i32, i32) {
    %c0_i32 = arith.constant 0 : i32
    %c0_i32_0 = arith.constant 0 : i32
    return %arg0, %c0_i32 : i32, i32
  }
}

</mosaic_0001>

<bundles_post_ra>
// kernel: tpu_custom_call.1
= control target key start
LH: loop header
LB: loop body
LE: loop exit
PB: predicated region body
PF: predicated region fallthrough
CT: control target
= control target key end

     0   :  { %s113_s0 = inlined_call_operand.<no memory space> [shape: f32[1], index: 0, kind: input, shape index: {}]   ;;  %s114_s1 = inlined_call_operand.hbm [shape: f32[2,128], index: 1, kind: output, shape index: {}]  }
   0x1   :  { %s11_s8 = smul.f32 16.0, %s113_s0 }
   0x2   :  { %7 = vsyncpa [#allocation4], 0  ;;  %v16_v2 = vlaneseq  ;;  %s87_s10 = smov [#allocation3]  }
   0x3   :  { %s12_s9 = smul.f32 %s11_s8, %s11_s8  ;;  %s46_s11 = sshll.u32 %s87_s10, 4  ;;  %s47_s11 = int_to_ptr.vmem [resolvable:$true] %s46_s11 }
   0x4   :  { %v17_v3 = vshrl.u32 %v16_v2, 7  ;;  %v22_v4 = vand.u32 127, %v16_v2  ;;  %s63_s12 = scalar_lea.vmem %s47_s11, 32  ;;  %p68_p1 = scmp.lt.s32.totalorder %s47_s11, %s47_s11 }
   0x5   :  { %v13_v0 = vstv %s12_s9  ;;  %p64_p0 = scmp.ne.s32.totalorder %s47_s11, %s63_s12  ;;  %p69_p2 = scmp.lt.s32.totalorder %s63_s12, %s63_s12 }
   0x6   :  { %59 = vrcp.f32 %v13_v0  ;;  %v23_v5 = vmul.u32 128, %v17_v3 }
   0x7   :  { %p70_p3 = por %p69_p2, %p68_p1 }
   0x8   :  { %v24_v6 = vadd.s32 %v23_v5, %v22_v4 }
   0x9   :  { %p71_p4 = pnand %p70_p3, %p64_p0 }
   0xa   :  { %v25_v7 = vand.u32 15, %v24_v6  ;;  %v26_v8 = vshra.s32 %v24_v6, 4 }
   0xc   :  { %v27_v9 = vcvt.s32.f32 %v25_v7  ;;  %v29_v10 = vcvt.s32.f32 %v26_v8 }
   0xe   :  { %v54_v11 = vadd.f32 -8.0, %v27_v9  ;;  %v55_v12 = vadd.f32 -8.0, %v29_v10 }
  0x10   :  { %v60_v1 = vpop.eup %59  ;;  %v31_v13 = vmul.f32 %v54_v11, %v54_v11  ;;  %v32_v14 = vmul.f32 %v55_v12, %v55_v12 }
  0x11   :  { %56 = vpush %v60_v1 }
  0x12   :  { %v33_v15 = vadd.f32 %v32_v14, %v31_v13 }
  0x14   :  { %v34_v16 = vmul.f32 -0.5, %v33_v15 }
  0x42   :  { %s57_s0 = spop %56 }
  0x43   :  { %v35_v17 = vstv %s57_s0 }
  0x44   :  { %v36_v18 = vmul.f32 %v35_v17, %v34_v16 }
  0x46   :  { %v37_v19 = vmul.f32 1.442695, %v36_v18 }
  0x48   :  { %61 = vpow2.f32 %v37_v19 }
  0x52   :  { %v62_v20 = vpop.eup %61 }
  0x53   :  { %39 = vst [vmem:[#allocation3] sm:$0x3] %v62_v20 }
  0x54   :  { %74 = shalt.err (!%p71_p4)
}
  0x55   :  { %s75_s15 = scalar_lea.hbm %s114_s1, 32 }
  0x56   :  { %p76_p5 = scmp.ne.s32.totalorder %s114_s1, %s75_s15  ;;  %p79_p6 = scmp.lt.u32.totalorder %s75_s15, %s114_s1 }
  0x58   :  { %p81_p7 = pnand %p79_p6, %p76_p5 }
  0x5a   :  { %84 = shalt.err (!%p81_p7)
}
  0x5b   :  { %49 = dma.vmem_to_hbm [thread:$0]  %s47_s11, 32, %s114_s1, [#allocation4]  }
  0x5c   :  { %85 = dma.done.wait [#allocation4], 32  }
  0x5d   :  { %86 = vsyncadd [#allocation4], 4294967264 }
  0x5e   :  { %53 = vsyncpa [#allocation4], 1 }

</bundles_post_ra>
